<compile_context>
chip_gen: v5e
topology: v5e:2x2
jax: 0.10.0
libtpu: 0.0.40
codegen_flags: <defaults>
</compile_context>

<pallas_src>
import functools

import numpy as np
import jax
import jax.numpy as jnp
from jax import lax
from jax.experimental import pallas as pl
from jax.experimental.pallas import tpu as pltpu

KSIZE = 4
STRIDE = 2
PAD = 1
EPS = 1e-5        # nn.InstanceNorm2d default eps
NEG_SLOPE = 0.2   # LeakyReLU(0.2)


def _ceil_to(x, m):
    return ((x + m - 1) // m) * m


def _vmem_budget_bytes():
    """Generation-aware VMEM budget: ~75% of physical VMEM, capped, with a safe fallback."""
    try:
        cap = int(pltpu.get_tpu_info().vmem_capacity_bytes)
        return min(cap * 3 // 4, 100 * 1024 * 1024)   # v7x: ~48 MiB, v5e/v6e: ~96 MiB
    except Exception:
        return 48 * 1024 * 1024                       # safe on all generations


def _step_vmem_bytes(tile_ho, w_out, c_k, c_out, n_dh):
    """Rough per-grid-step VMEM footprint (double-buffered blocks, lane/sublane padded)."""
    slab_rows = (tile_ho + (n_dh - 1)) * w_out
    tile_p = tile_ho * w_out
    ck_l = _ceil_to(c_k, 128)
    co_l = _ceil_to(c_out, 128)
    p1 = (2 * _ceil_to(slab_rows, 16) * ck_l * 2       # bf16 input slab, double buffered
          + 2 * _ceil_to(tile_p, 16) * co_l * 2        # bf16 y block, double buffered
          + _ceil_to(tile_p, 8) * co_l * 4             # f32 accumulator scratch
          + 2 * n_dh * _ceil_to(c_k, 16) * co_l * 2    # resident weight (2 buffers)
          + 4 * 8 * co_l * 4)                          # stats blocks
    p2 = (2 * _ceil_to(tile_p, 16) * co_l * 2          # bf16 y in
          + 2 * _ceil_to(tile_p, 8) * co_l * 4         # f32 out
          + 2 * 8 * co_l * 4)
    return max(p1, p2)


def _choose_tile_ho(h_out, w_out, c_k, c_out, n_dh, vmem_budget):
    """Largest divisor of h_out whose tile is sublane-aligned (bf16: 16 rows) and fits VMEM."""
    cands = [c for c in range(1, h_out + 1)
             if h_out % c == 0 and ((c * w_out) % 16 == 0 or c == h_out)]
    fitting = [c for c in cands
               if _step_vmem_bytes(c, w_out, c_k, c_out, n_dh) <= vmem_budget]
    return max(fitting) if fitting else min(cands)


def _prep_input(x, tile_ho, fold_dh):
    """Parity-split the padded NCHW input and fold the half-shifts into the contraction axis.

    Returns bf16 (N*T, slab_rows, c_k) with
      fold_dh=False: slab_rows=(tile_ho+1)*w_out, c_k=8*C_in,
        out[nT, a*w_out+wo, dw*4C + (rp*2+cp)*C + ci] = x_pad[n, ci, 2*(t*tile_ho+a)+rp, 2*(wo+dw)+cp]
      fold_dh=True:  slab_rows=tile_ho*w_out,    c_k=16*C_in (dh also folded; pure reshape, no halo).
    """
    n, c_in, h, w = x.shape
    h_out, w_out = h // 2, w // 2
    h_half, w_half = h_out + 1, w_out + 1
    c4 = 4 * c_in
    t_tiles = h_out // tile_ho

    xb = x.astype(jnp.bfloat16)
    x_pad = jnp.pad(xb, ((0, 0), (0, 0), (PAD, PAD), (PAD, PAD)))        # (N, C, H+2, W+2)
    # padded row = 2*a + rp, padded col = 2*b + cp  ->  (N, h_half, w_half, 4*C_in)
    xc = x_pad.reshape(n, c_in, h_half, 2, w_half, 2)
    xc = xc.transpose(0, 2, 4, 3, 5, 1).reshape(n, h_half, w_half, c4)
    # fold the kw half-shift (dw) into the contraction axis
    xcat = jnp.concatenate([xc[:, :, 0:w_out, :], xc[:, :, 1:w_out + 1, :]], axis=-1)
    if fold_dh:
        # also fold the kh half-shift (dh): no halo needed, pure reshape into tiles
        xfull = jnp.concatenate([xcat[:, 0:h_out], xcat[:, 1:h_out + 1]], axis=-1)
        return xfull.reshape(n * t_tiles, tile_ho * w_out, 4 * c4)
    # halo slabs of (tile_ho + 1) rows along the half-resolution row axis
    slabs = [lax.slice_in_dim(xcat, t * tile_ho, t * tile_ho + tile_ho + 1, axis=1)
             for t in range(t_tiles)]
    xt = jnp.stack(slabs, axis=1)                     # (N, T, tile_ho+1, w_out, 2*c4)
    return xt.reshape(n * t_tiles, (tile_ho + 1) * w_out, 2 * c4)


def _prep_weight(weight, fold_dh):
    """(C_out, C_in, 4, 4) -> bf16 (n_dh, c_k, C_out), contraction layout matching _prep_input."""
    c_out, c_in = weight.shape[:2]
    w6 = weight.reshape(c_out, c_in, 2, 2, 2, 2)      # (co, ci, dh, rp, dw, cp)
    wt = w6.transpose(2, 4, 3, 5, 1, 0)               # (dh, dw, rp, cp, ci, co)
    if fold_dh:
        wt = wt.reshape(1, 16 * c_in, c_out)
    else:
        wt = wt.reshape(2, 8 * c_in, c_out)
    return wt.astype(jnp.bfloat16)


@functools.partial(jax.jit,
                   static_argnames=("tile_ho", "fold_dh", "splits", "channels_last"))
def unet_down(x, weight, tile_ho=None, fold_dh=None, splits=None, channels_last=False):
    """x: (N, C_in, H, W) f32, weight: (C_out, C_in, 4, 4) f32 -> (N, C_out, H//2, W//2) f32."""
    n, c_in, h, w = x.shape
    c_out = weight.shape[0]
    assert weight.shape == (c_out, c_in, KSIZE, KSIZE)
    assert h % 2 == 0 and w % 2 == 0, "H and W must be even for k=4, s=2, p=1"
    h_out, w_out = h // 2, w // 2
    p_total = h_out * w_out
    inv_p = 1.0 / float(p_total)

    if fold_dh is None:
        fold_dh = c_in <= 16              # small C_in: widen K to 16*C_in for MXU utilization
    n_dh = 1 if fold_dh else 2
    c_k = (16 if fold_dh else 8) * c_in

    vmem_limit = _vmem_budget_bytes()

    if tile_ho is None:
        tile_ho = _choose_tile_ho(h_out, w_out, c_k, c_out, n_dh, vmem_limit)
    assert h_out % tile_ho == 0
    t_tiles = h_out // tile_ho
    tile_p = tile_ho * w_out
    assert tile_p % 16 == 0 or t_tiles == 1
    slab_rows = (tile_ho + (n_dh - 1)) * w_out

    if splits is None:
        splits = 2 if (n < 2 and t_tiles % 2 == 0) else 1   # v7x megacore for batch-1
    assert t_tiles % splits == 0
    tps = t_tiles // splits

    xt = _prep_input(x, tile_ho, fold_dh)     # (N*T, slab_rows, c_k) bf16
    wt = _prep_weight(weight, fold_dh)        # (n_dh, c_k, C_out) bf16

    # ---- pass 1: conv as n_dh MXU matmuls + per-channel sum / sum-of-squares (partial stats) ----
    def conv_stats_kernel(x_ref, w_ref, y_ref, s_ref, acc_ref):
        t = pl.program_id(2)

        @pl.when(t == 0)
        def _init():
            s_ref[...] = jnp.zeros_like(s_ref)

        for dh in range(n_dh):               # static unroll; dh row-shift via static slab slice
            xs = x_ref[0, dh * w_out:dh * w_out + tile_p, :]        # (tile_p, c_k) bf16
            part = jnp.dot(xs, w_ref[dh], preferred_element_type=jnp.float32)
            if dh == 0:
                acc_ref[...] = part
            else:
                acc_ref[...] = acc_ref[...] + part
        acc = acc_ref[...]
        y_ref[0] = acc.astype(y_ref.dtype)                           # bf16 intermediate
        tile_stats = jnp.concatenate(
            [jnp.sum(acc, axis=0, keepdims=True),
             jnp.sum(acc * acc, axis=0, keepdims=True)], axis=0)     # (2, C_out) f32
        s_ref[0, 0] = s_ref[0, 0] + tile_stats                       # single coalesced RMW

    y, stats = pl.pallas_call(
        conv_stats_kernel,
        out_shape=(jax.ShapeDtypeStruct((n, p_total, c_out), jnp.bfloat16),
                   jax.ShapeDtypeStruct((n, splits, 2, c_out), jnp.float32)),
        grid_spec=pltpu.PrefetchScalarGridSpec(
            num_scalar_prefetch=0,
            grid=(n, splits, tps),
            in_specs=[
                pl.BlockSpec((1, slab_rows, c_k),
                             lambda i, s, t: (i * t_tiles + s * tps + t, 0, 0)),
                pl.BlockSpec((n_dh, c_k, c_out), lambda i, s, t: (0, 0, 0)),   # resident weight
            ],
            out_specs=[
                pl.BlockSpec((1, tile_p, c_out), lambda i, s, t: (i, s * tps + t, 0)),
                pl.BlockSpec((1, 1, 2, c_out), lambda i, s, t: (i, s, 0, 0)),  # stats accumulator
            ],
            scratch_shapes=[pltpu.VMEM((tile_p, c_out), jnp.float32)],
        ),
        compiler_params=pltpu.CompilerParams(
            dimension_semantics=("parallel", "parallel", "arbitrary"),
            vmem_limit_bytes=vmem_limit),
    )(xt, wt)

    # ---- pass 2: combine partial stats, InstanceNorm + LeakyReLU (no padded channels) ----
    def norm_lrelu_kernel(y_ref, s_ref, o_ref):
        s = jnp.sum(s_ref[0], axis=0)                                # (2, C_out) f32
        mean = s[0:1, :] * inv_p
        var = jnp.maximum(s[1:2, :] * inv_p - mean * mean, 0.0)
        scale = lax.rsqrt(var + EPS)
        yh = (y_ref[0].astype(jnp.float32) - mean) * scale
        o_ref[0] = jnp.where(yh >= 0, yh, NEG_SLOPE * yh)

    out_flat = pl.pallas_call(
        norm_lrelu_kernel,
        out_shape=jax.ShapeDtypeStruct((n, p_total, c_out), jnp.float32),
        grid_spec=pltpu.PrefetchScalarGridSpec(
            num_scalar_prefetch=0,
            grid=(n, t_tiles),
            in_specs=[
                pl.BlockSpec((1, tile_p, c_out), lambda i, t: (i, t, 0)),
                pl.BlockSpec((1, splits, 2, c_out), lambda i, t: (i, 0, 0, 0)),
            ],
            out_specs=pl.BlockSpec((1, tile_p, c_out), lambda i, t: (i, t, 0)),
        ),
        compiler_params=pltpu.CompilerParams(
            dimension_semantics=("parallel", "parallel"),
            vmem_limit_bytes=vmem_limit),
    )(y, stats)

    out = out_flat.reshape(n, h_out, w_out, c_out)
    if channels_last:
        return out                                  # NHWC: skips the extra transpose pass
    # NCHW to match the PyTorch module contract.
    return out.transpose(0, 3, 1, 2)


def _reference(x, weight):
    """Plain-JAX reference matching the kernel numerics (bf16 MXU operands, f32 stats, bf16 y)."""
    xb = x.astype(jnp.bfloat16).astype(jnp.float32)
    wb = weight.astype(jnp.bfloat16).astype(jnp.float32)
    y = lax.conv_general_dilated(
        xb, wb, window_strides=(STRIDE, STRIDE), padding=((PAD, PAD), (PAD, PAD)),
        dimension_numbers=("NCHW", "OIHW", "NCHW"), precision=lax.Precision.HIGHEST)
    mean = jnp.mean(y, axis=(2, 3), keepdims=True)
    var = jnp.maximum(jnp.mean(y * y, axis=(2, 3), keepdims=True) - mean * mean, 0.0)
    yb = y.astype(jnp.bfloat16).astype(jnp.float32)   # kernel stores the conv intermediate in bf16
    y_hat = (yb - mean) * lax.rsqrt(var + EPS)
    return jnp.where(y_hat >= 0, y_hat, NEG_SLOPE * y_hat)


if __name__ == "__main__":
    # UNetDown(in_size=4, out_size=8, normalize=True, dropout=0.0)
    in_size, out_size = 4, 8
    N, H, W = 2, 16, 16

    key = jax.random.PRNGKey(0)
    kx, kw = jax.random.split(key)
    x = jax.random.normal(kx, (N, in_size, H, W), dtype=jnp.float32)
    fan_in = in_size * KSIZE * KSIZE
    weight = jax.random.normal(kw, (out_size, in_size, KSIZE, KSIZE),
                               dtype=jnp.float32) / np.sqrt(fan_in)

    # default path: auto tile (single spatial tile), dh folded (C_in <= 16), single-split stats
    out_auto = jax.block_until_ready(unet_down(x, weight))
    # forced path: halo-slab kernel (fold_dh=False), 2 spatial tiles, 2-way partial-stats split
    out_tiled = jax.block_until_ready(unet_down(x, weight, tile_ho=4, fold_dh=False, splits=2))

    ref = jax.block_until_ready(_reference(x, weight))

    assert out_auto.shape == (N, out_size, H // 2, W // 2)
    assert out_tiled.shape == (N, out_size, H // 2, W // 2)
    np.testing.assert_allclose(np.asarray(out_auto), np.asarray(ref), atol=1e-2, rtol=1e-2)
    np.testing.assert_allclose(np.asarray(out_tiled), np.asarray(ref), atol=1e-2, rtol=1e-2)

    print("KERNEL_OK")
</pallas_src>

<mosaic_0001>
module attributes {stable_mosaic.version = 11 : i64} {
  func.func @conv_stats_kernel(%arg0: i32, %arg1: i32, %arg2: i32, %arg3: memref<1x64x64xbf16, #tpu.memory_space<vmem>>, %arg4: memref<1x64x8xbf16, #tpu.memory_space<vmem>>, %arg5: memref<1x64x8xbf16, #tpu.memory_space<vmem>>, %arg6: memref<1x1x2x8xf32, #tpu.memory_space<vmem>>, %arg7: memref<64x8xf32, #tpu.memory_space<vmem>>) attributes {dimension_semantics = [#tpu.dimension_semantics<parallel>, #tpu.dimension_semantics<parallel>, #tpu.dimension_semantics<arbitrary>], iteration_bounds = array<i64: 2, 1, 1>, scalar_prefetch = 0 : i64, scratch_operands = 1 : i64, tpu.core_type = #tpu.core_type<tc>, window_params = [{transform_indices = @transform_0, window_bounds = array<i64: 1, 64, 64>}, {pipeline_mode = #tpu.pipeline_mode<synchronous>, transform_indices = @transform_1, window_bounds = array<i64: 1, 64, 8>}, {transform_indices = @transform_2, window_bounds = array<i64: 1, 64, 8>}, {transform_indices = @transform_3, window_bounds = array<i64: 1, 1, 2, 8>}]} {
    %c0_i32 = arith.constant 0 : i32
    %0 = arith.cmpi eq, %arg2, %c0_i32 : i32
    %1 = arith.extui %0 : i1 to i32
    %c0_i32_0 = arith.constant 0 : i32
    %2 = arith.cmpi ne, %1, %c0_i32_0 : i32
    scf.if %2 {
      %cst_23 = arith.constant 0.000000e+00 : f32
      %26 = vector.broadcast %cst_23 : f32 to vector<1x1x2x8xf32>
      %c0_24 = arith.constant 0 : index
      %c0_25 = arith.constant 0 : index
      %c0_26 = arith.constant 0 : index
      %c0_27 = arith.constant 0 : index
      %27 = vector.load %arg6[%c0_24, %c0_25, %c0_26, %c0_27] : memref<1x1x2x8xf32, #tpu.memory_space<vmem>>, vector<1x1x2x8xf32>
      tpu.vector_store %arg6[%c0_24, %c0_25, %c0_26, %c0_27], %26 {strides = array<i32>} : memref<1x1x2x8xf32, #tpu.memory_space<vmem>>, vector<1x1x2x8xf32>,
    } else {
    }
    %c0 = arith.constant 0 : index
    %c0_1 = arith.constant 0 : index
    %c0_2 = arith.constant 0 : index
    %3 = vector.load %arg3[%c0, %c0_1, %c0_2] : memref<1x64x64xbf16, #tpu.memory_space<vmem>>, vector<1x64x64xbf16>
    %4 = vector.shape_cast %3 : vector<1x64x64xbf16> to vector<64x64xbf16>
    %c0_3 = arith.constant 0 : index
    %c0_4 = arith.constant 0 : index
    %c0_5 = arith.constant 0 : index
    %5 = vector.load %arg4[%c0_3, %c0_4, %c0_5] : memref<1x64x8xbf16, #tpu.memory_space<vmem>>, vector<1x64x8xbf16>
    %6 = vector.shape_cast %5 : vector<1x64x8xbf16> to vector<64x8xbf16>
    %cst = arith.constant dense<0.000000e+00> : vector<64x8xf32>
    %7 = tpu.matmul %4, %6, %cst {dimension_numbers = #tpu.dot_dimension_numbers<[1], [0], [0], [1], [0, 0, 1, 1], [], []>} : vector<64x64xbf16>, vector<64x8xbf16>, vector<64x8xf32> -> vector<64x8xf32>
    %c0_6 = arith.constant 0 : index
    %c0_7 = arith.constant 0 : index
    %8 = vector.load %arg7[%c0_6, %c0_7] : memref<64x8xf32, #tpu.memory_space<vmem>>, vector<64x8xf32>
    tpu.vector_store %arg7[%c0_6, %c0_7], %7 {strides = array<i32>} : memref<64x8xf32, #tpu.memory_space<vmem>>, vector<64x8xf32>,
    %c0_8 = arith.constant 0 : index
    %c0_9 = arith.constant 0 : index
    %9 = vector.load %arg7[%c0_8, %c0_9] : memref<64x8xf32, #tpu.memory_space<vmem>>, vector<64x8xf32>
    %10 = arith.truncf %9 : vector<64x8xf32> to vector<64x8xbf16>
    %c0_10 = arith.constant 0 : index
    %c0_11 = arith.constant 0 : index
    %c0_12 = arith.constant 0 : index
    %11 = vector.load %arg5[%c0_10, %c0_11, %c0_12] : memref<1x64x8xbf16, #tpu.memory_space<vmem>>, vector<1x64x8xbf16>
    %12 = vector.shape_cast %11 : vector<1x64x8xbf16> to vector<64x8xbf16>
    %13 = vector.shape_cast %10 : vector<64x8xbf16> to vector<1x64x8xbf16>
    tpu.vector_store %arg5[%c0_10, %c0_11, %c0_12], %13 {strides = array<i32>} : memref<1x64x8xbf16, #tpu.memory_space<vmem>>, vector<1x64x8xbf16>,
    %cst_13 = arith.constant dense<0.000000e+00> : vector<8xf32>
    %14 = vector.multi_reduction <add>, %9, %cst_13 [0] : vector<64x8xf32> to vector<8xf32>
    %15 = vector.shape_cast %14 : vector<8xf32> to vector<1x8xf32>
    %16 = arith.mulf %9, %9 : vector<64x8xf32>
    %cst_14 = arith.constant dense<0.000000e+00> : vector<8xf32>
    %17 = vector.multi_reduction <add>, %16, %cst_14 [0] : vector<64x8xf32> to vector<8xf32>
    %18 = vector.shape_cast %17 : vector<8xf32> to vector<1x8xf32>
    %19 = tpu.concatenate %15, %18 in 0 : vector<1x8xf32>, vector<1x8xf32> -> vector<2x8xf32>
    %c0_15 = arith.constant 0 : index
    %c0_16 = arith.constant 0 : index
    %c0_17 = arith.constant 0 : index
    %c0_18 = arith.constant 0 : index
    %20 = vector.load %arg6[%c0_15, %c0_16, %c0_17, %c0_18] : memref<1x1x2x8xf32, #tpu.memory_space<vmem>>, vector<1x1x2x8xf32>
    %21 = vector.shape_cast %20 : vector<1x1x2x8xf32> to vector<2x8xf32>
    %22 = arith.addf %21, %19 : vector<2x8xf32>
    %c0_19 = arith.constant 0 : index
    %c0_20 = arith.constant 0 : index
    %c0_21 = arith.constant 0 : index
    %c0_22 = arith.constant 0 : index
    %23 = vector.load %arg6[%c0_19, %c0_20, %c0_21, %c0_22] : memref<1x1x2x8xf32, #tpu.memory_space<vmem>>, vector<1x1x2x8xf32>
    %24 = vector.shape_cast %23 : vector<1x1x2x8xf32> to vector<2x8xf32>
    %25 = vector.shape_cast %22 : vector<2x8xf32> to vector<1x1x2x8xf32>
    tpu.vector_store %arg6[%c0_19, %c0_20, %c0_21, %c0_22], %25 {strides = array<i32>} : memref<1x1x2x8xf32, #tpu.memory_space<vmem>>, vector<1x1x2x8xf32>,
    return
  }
  func.func @transform_0(%arg0: i32, %arg1: i32, %arg2: i32) -> (i32, i32, i32) {
    %c1_i32 = arith.constant 1 : i32
    %0 = arith.muli %arg0, %c1_i32 : i32
    %c1_i32_0 = arith.constant 1 : i32
    %1 = arith.muli %arg1, %c1_i32_0 : i32
    %2 = arith.addi %0, %1 : i32
    %3 = arith.addi %2, %arg2 : i32
    %c0_i32 = arith.constant 0 : i32
    %c0_i32_1 = arith.constant 0 : i32
    %c0_i32_2 = arith.constant 0 : i32
    return %3, %c0_i32, %c0_i32_1 : i32, i32, i32
  }
  func.func @transform_1(%arg0: i32, %arg1: i32, %arg2: i32) -> (i32, i32, i32) {
    %c0_i32 = arith.constant 0 : i32
    %c0_i32_0 = arith.constant 0 : i32
    %c0_i32_1 = arith.constant 0 : i32
    %c0_i32_2 = arith.constant 0 : i32
    return %c0_i32, %c0_i32_0, %c0_i32_1 : i32, i32, i32
  }
  func.func @transform_2(%arg0: i32, %arg1: i32, %arg2: i32) -> (i32, i32, i32) {
    %c1_i32 = arith.constant 1 : i32
    %0 = arith.muli %arg1, %c1_i32 : i32
    %1 = arith.addi %0, %arg2 : i32
    %c0_i32 = arith.constant 0 : i32
    %c0_i32_0 = arith.constant 0 : i32
    return %arg0, %1, %c0_i32 : i32, i32, i32
  }
  func.func @transform_3(%arg0: i32, %arg1: i32, %arg2: i32) -> (i32, i32, i32, i32) {
    %c0_i32 = arith.constant 0 : i32
    %c0_i32_0 = arith.constant 0 : i32
    %c0_i32_1 = arith.constant 0 : i32
    return %arg0, %arg1, %c0_i32, %c0_i32_0 : i32, i32, i32, i32
  }
}

module attributes {stable_mosaic.version = 11 : i64} {
  func.func @norm_lrelu_kernel(%arg0: i32, %arg1: i32, %arg2: memref<1x64x8xbf16, #tpu.memory_space<vmem>>, %arg3: memref<1x1x2x8xf32, #tpu.memory_space<vmem>>, %arg4: memref<1x64x8xf32, #tpu.memory_space<vmem>>) attributes {dimension_semantics = [#tpu.dimension_semantics<parallel>, #tpu.dimension_semantics<parallel>], iteration_bounds = array<i64: 2, 1>, scalar_prefetch = 0 : i64, scratch_operands = 0 : i64, tpu.core_type = #tpu.core_type<tc>, window_params = [{transform_indices = @transform_0, window_bounds = array<i64: 1, 64, 8>}, {transform_indices = @transform_1, window_bounds = array<i64: 1, 1, 2, 8>}, {transform_indices = @transform_2, window_bounds = array<i64: 1, 64, 8>}]} {
    %c0 = arith.constant 0 : index
    %c0_0 = arith.constant 0 : index
    %c0_1 = arith.constant 0 : index
    %c0_2 = arith.constant 0 : index
    %0 = vector.load %arg3[%c0, %c0_0, %c0_1, %c0_2] : memref<1x1x2x8xf32, #tpu.memory_space<vmem>>, vector<1x1x2x8xf32>
    %1 = vector.shape_cast %0 : vector<1x1x2x8xf32> to vector<1x2x8xf32>
    %cst = arith.constant dense<0.000000e+00> : vector<2x8xf32>
    %2 = vector.multi_reduction <add>, %1, %cst [0] : vector<1x2x8xf32> to vector<2x8xf32>
    %3 = vector.extract_strided_slice %2 {offsets = [0, 0], sizes = [1, 8], strides = [1, 1]} : vector<2x8xf32> to vector<1x8xf32>
    %cst_3 = arith.constant 1.562500e-02 : f32
    %4 = vector.broadcast %cst_3 : f32 to vector<1x8xf32>
    %5 = arith.mulf %3, %4 : vector<1x8xf32>
    %6 = vector.extract_strided_slice %2 {offsets = [1, 0], sizes = [1, 8], strides = [1, 1]} : vector<2x8xf32> to vector<1x8xf32>
    %cst_4 = arith.constant 1.562500e-02 : f32
    %7 = vector.broadcast %cst_4 : f32 to vector<1x8xf32>
    %8 = arith.mulf %6, %7 : vector<1x8xf32>
    %9 = arith.mulf %5, %5 : vector<1x8xf32>
    %10 = arith.subf %8, %9 : vector<1x8xf32>
    %cst_5 = arith.constant 0.000000e+00 : f32
    %11 = vector.broadcast %cst_5 : f32 to vector<1x8xf32>
    %12 = arith.maximumf %10, %11 : vector<1x8xf32>
    %cst_6 = arith.constant 9.99999974E-6 : f32
    %13 = vector.broadcast %cst_6 : f32 to vector<1x8xf32>
    %14 = arith.addf %12, %13 : vector<1x8xf32>
    %15 = math.rsqrt %14 : vector<1x8xf32>
    %c0_7 = arith.constant 0 : index
    %c0_8 = arith.constant 0 : index
    %c0_9 = arith.constant 0 : index
    %16 = vector.load %arg2[%c0_7, %c0_8, %c0_9] : memref<1x64x8xbf16, #tpu.memory_space<vmem>>, vector<1x64x8xbf16>
    %17 = vector.shape_cast %16 : vector<1x64x8xbf16> to vector<64x8xbf16>
    %18 = arith.extf %17 : vector<64x8xbf16> to vector<64x8xf32>
    %19 = vector.broadcast %5 : vector<1x8xf32> to vector<64x8xf32>
    %20 = arith.subf %18, %19 : vector<64x8xf32>
    %21 = vector.broadcast %15 : vector<1x8xf32> to vector<64x8xf32>
    %22 = arith.mulf %20, %21 : vector<64x8xf32>
    %cst_10 = arith.constant 0.000000e+00 : f32
    %23 = vector.broadcast %cst_10 : f32 to vector<64x8xf32>
    %24 = arith.cmpf oge, %22, %23 : vector<64x8xf32>
    %cst_11 = arith.constant 2.000000e-01 : f32
    %25 = vector.broadcast %cst_11 : f32 to vector<64x8xf32>
    %26 = arith.mulf %25, %22 : vector<64x8xf32>
    %27 = arith.select %24, %22, %26 : vector<64x8xi1>, vector<64x8xf32>
    %c0_12 = arith.constant 0 : index
    %c0_13 = arith.constant 0 : index
    %c0_14 = arith.constant 0 : index
    %28 = vector.load %arg4[%c0_12, %c0_13, %c0_14] : memref<1x64x8xf32, #tpu.memory_space<vmem>>, vector<1x64x8xf32>
    %29 = vector.shape_cast %28 : vector<1x64x8xf32> to vector<64x8xf32>
    %30 = vector.shape_cast %27 : vector<64x8xf32> to vector<1x64x8xf32>
    tpu.vector_store %arg4[%c0_12, %c0_13, %c0_14], %30 {strides = array<i32>} : memref<1x64x8xf32, #tpu.memory_space<vmem>>, vector<1x64x8xf32>,
    return
  }
  func.func @transform_0(%arg0: i32, %arg1: i32) -> (i32, i32, i32) {
    %c0_i32 = arith.constant 0 : i32
    %c0_i32_0 = arith.constant 0 : i32
    return %arg0, %arg1, %c0_i32 : i32, i32, i32
  }
  func.func @transform_1(%arg0: i32, %arg1: i32) -> (i32, i32, i32, i32) {
    %c0_i32 = arith.constant 0 : i32
    %c0_i32_0 = arith.constant 0 : i32
    %c0_i32_1 = arith.constant 0 : i32
    %c0_i32_2 = arith.constant 0 : i32
    return %arg0, %c0_i32, %c0_i32_0, %c0_i32_1 : i32, i32, i32, i32
  }
  func.func @transform_2(%arg0: i32, %arg1: i32) -> (i32, i32, i32) {
    %c0_i32 = arith.constant 0 : i32
    %c0_i32_0 = arith.constant 0 : i32
    return %arg0, %arg1, %c0_i32 : i32, i32, i32
  }
}

</mosaic_0001>

<bundles_post_ra>
// kernel: unet_down.3
= control target key start
LH: loop header
LB: loop body
LE: loop exit
PB: predicated region body
PF: predicated region fallthrough
CT: control target
= control target key end

     0   :  { %s484_s9 = smov 0   ;;  %s486_s10 = smov 0   ;;  %s543_s0 = inlined_call_operand.vmem [shape: bf16[2,64,8], index: 0, kind: input, shape index: {}]   ;;  %s544_s1 = inlined_call_operand.vmem [shape: f32[2,1,2,8], index: 1, kind: input, shape index: {}]   ;;  %s545_s2 = inlined_call_operand.vmem [shape: f32[2,64,8], index: 2, kind: output, shape index: {}]  }
   0x1   :  { %s488_s11 = smov 0  }
   0x2 LB: > { %s24_s12 = sadd.s32 1, %s463_s10  ;;  %p390_p0 = scmp.ge.s32.totalorder %s467_s11, 1  ;;  %s467_s11 = sphi %s488_s11, %s12_s11   ;;  %s463_s10 = sphi %s486_s10, %s547_s10   ;;  %s459_s9 = sphi %s484_s9, %s546_s9  }
   0x3   : > { %p26_p1 = scmp.ge.s32.totalorder %s24_s12, 2  ;;  %p142_p2 = scmp.lt.s32.totalorder %s467_s11, 3 }
   0x5   : > { %s549_s12 = smov (%p26_p1, %s24_s12), 0  ;;  %p143_p3 = pnand %p390_p0, %p142_p2 }
   0x6   : > { %p177_p4 = scmp.lt.s32.totalorder (!%p143_p3), %s459_s9, 1 }
   0x7   : > { %146 = sbr.rel (%p143_p3) target bundleno = 61 (0x3d), region = 28 }
   0xc   : > { %s551_s9 = smov (!%p177_p4, %s459_s9), 1  ;;  %vm278_vm3 = vcmask 64512  }
   0xd   : > { %s393_s13 = sshll.u32 %s551_s9, 1  ;;  %s398_s17 = sshll.u32 %s551_s9, 5 }
   0xe   : > { %s189_s16 = scalar_lea.vmem %s544_s1, %s393_s13  ;;  %s184_s20 = scalar_lea.vmem %s543_s0, %s398_s17 }
   0xf   : > { %v200_v0 = vld [vmem:[%s189_s16] sm:$0x3]  ;;  %v416_v11 = vld [vmem:[%s184_s20 + $0x8] sm:$0xff]   ;;  %v417_v12 = vld [vmem:[%s184_s20 + $0x10] sm:$0xff]   ;;  %s399_s21 = sshll.u32 %s551_s9, 6 }
  0x10   : > { %v202_v1 = vmul.f32 0.015625, %v200_v0  ;;  %v401_v9 = vld [vmem:[%s184_s20] sm:$0xff]   ;;  %v418_v14 = vld [vmem:[%s184_s20 + $0x18] sm:$0xff]   ;;  %v406_v18 = vunpack.c.l.bf16 %v416_v11  ;;  %v407_v19 = vunpack.c.h.bf16 %v416_v11  ;;  %v410_v20 = vunpack.c.l.bf16 %v417_v12  ;;  %s516_s24 = scalar_lea.vmem %s545_s2, %s399_s21 }
  0x11   : > { %v402_v13 = vunpack.c.l.bf16 %v401_v9  ;;  %v403_v17 = vunpack.c.h.bf16 %v401_v9  ;;  %v411_v22 = vunpack.c.h.bf16 %v417_v12  ;;  %v414_v23 = vunpack.c.l.bf16 %v418_v14 }
  0x12   : > { %v203_v2 = vmul.f32 %v202_v1, %v202_v1  ;;  %v236_v16 = vperm.slane %v202_v1, 0  ;;  %v415_v24 = vunpack.c.h.bf16 %v418_v14 }
  0x14   : > { %v205_v3 = vrot.slane %v203_v2, 7  ;;  %v237_v26 = vsub.f32 %v402_v13, %v236_v16  ;;  %v238_v27 = vsub.f32 %v403_v17, %v236_v16  ;;  %v239_v28 = vsub.f32 %v406_v18, %v236_v16 }
  0x15   : > { %v240_v29 = vsub.f32 %v407_v19, %v236_v16  ;;  %v241_v30 = vsub.f32 %v410_v20, %v236_v16  ;;  %v242_v32 = vsub.f32 %v411_v22, %v236_v16  ;;  %v243_v33 = vsub.f32 %v414_v23, %v236_v16 }
  0x16   : > { %v207_v4 = vsub.f32 %v202_v1, %v205_v3  ;;  %v244_v34 = vsub.f32 %v415_v24, %v236_v16 }
  0x18   : > { %v208_v5 = vmax.f32 %v207_v4, 0.0 }
  0x1a   : > { %v209_v6 = vadd.f32 1e-05, %v208_v5 }
  0x1c   : > { %443 = vrsqrt.f32 %v209_v6  ;;  %vm216_vm0 = vweird.f32 %v209_v6 }
  0x22   : > { %v444_v7 = vpop.eup %443 }
  0x23   : > { %v211_v8 = vmul.f32 %v444_v7, %v209_v6  ;;  %vm217_vm1 = vweird.f32 %v444_v7 }
  0x24   : > { %vm218_vm2 = vmor %vm216_vm0, %vm217_vm1 }
  0x25   : > { %v212_v10 = vmul.f32 %v444_v7, %v211_v8 }
  0x27   : > { %v213_v15 = vmul.f32 0.5, %v212_v10 }
  0x29   : > { %v214_v21 = vsub.f32 1.5, %v213_v15 }
  0x2b   : > { %v215_v25 = vmul.f32 %v444_v7, %v214_v21 }
  0x2d   : > { %v219_v31 = vsel %vm218_vm2, %v444_v7, %v215_v25 }
  0x2e   : > { %v245_v35 = vperm.slane %v219_v31, 1 }
  0x30   : > { %v246_v36 = vmul.f32 %v245_v35, %v237_v26  ;;  %v247_v37 = vmul.f32 %v245_v35, %v238_v27  ;;  %v248_v38 = vmul.f32 %v245_v35, %v239_v28  ;;  %v249_v39 = vmul.f32 %v245_v35, %v240_v29 }
  0x31   : > { %v250_v40 = vmul.f32 %v245_v35, %v241_v30  ;;  %v251_v41 = vmul.f32 %v245_v35, %v242_v32  ;;  %v252_v42 = vmul.f32 %v245_v35, %v243_v33  ;;  %v253_v43 = vmul.f32 %v245_v35, %v244_v34 }
  0x32   : > { %vm254_vm4 = vcmp.ge.f32.partialorder %v246_v36, 0.0  ;;  %v262_v44 = vmul.f32 0.2, %v246_v36  ;;  %vm255_vm5 = vcmp.ge.f32.partialorder %v247_v37, 0.0  ;;  %v263_v45 = vmul.f32 0.2, %v247_v37 }
  0x33   : > { %vm256_vm6 = vcmp.ge.f32.partialorder %v248_v38, 0.0  ;;  %v264_v46 = vmul.f32 0.2, %v248_v38  ;;  %vm257_vm7 = vcmp.ge.f32.partialorder %v249_v39, 0.0  ;;  %v265_v47 = vmul.f32 0.2, %v249_v39 }
  0x34   : > { %v270_v48 = vsel %vm254_vm4, %v246_v36, %v262_v44  ;;  %v271_v49 = vsel %vm255_vm5, %v247_v37, %v263_v45  ;;  %vm258_vm8 = vcmp.ge.f32.partialorder %v250_v40, 0.0  ;;  %v266_v50 = vmul.f32 0.2, %v250_v40 }
  0x35   : > { %279 = vst.msk [vmem:[%s516_s24] sm:$0xff] %vm278_vm3, %v270_v48  ;;  %v272_v51 = vsel %vm256_vm6, %v248_v38, %v264_v46  ;;  %v273_v52 = vsel %vm257_vm7, %v249_v39, %v265_v47  ;;  %vm259_vm9 = vcmp.ge.f32.partialorder %v251_v41, 0.0  ;;  %v267_v53 = vmul.f32 0.2, %v251_v41 }
  0x36   : > { %280 = vst.msk [vmem:[%s516_s24 + $0x8] sm:$0xff] %vm278_vm3, %v271_v49  ;;  %v274_v54 = vsel %vm258_vm8, %v250_v40, %v266_v50  ;;  %vm260_vm10 = vcmp.ge.f32.partialorder %v252_v42, 0.0  ;;  %v268_v55 = vmul.f32 0.2, %v252_v42  ;;  %vm261_vm11 = vcmp.ge.f32.partialorder %v253_v43, 0.0 }
  0x37   : > { %281 = vst.msk [vmem:[%s516_s24 + $0x10] sm:$0xff] %vm278_vm3, %v272_v51  ;;  %v275_v56 = vsel %vm259_vm9, %v251_v41, %v267_v53  ;;  %v269_v57 = vmul.f32 0.2, %v253_v43 }
  0x38   : > { %282 = vst.msk [vmem:[%s516_s24 + $0x18] sm:$0xff] %vm278_vm3, %v273_v52  ;;  %v276_v58 = vsel %vm260_vm10, %v252_v42, %v268_v55 }
  0x39   : > { %283 = vst.msk [vmem:[%s516_s24 + $0x20] sm:$0xff] %vm278_vm3, %v274_v54  ;;  %v277_v59 = vsel %vm261_vm11, %v253_v43, %v269_v57 }
  0x3a   : > { %284 = vst.msk [vmem:[%s516_s24 + $0x28] sm:$0xff] %vm278_vm3, %v275_v56 }
  0x3b   : > { %285 = vst.msk [vmem:[%s516_s24 + $0x30] sm:$0xff] %vm278_vm3, %v276_v58 }
  0x3c   : > { %286 = vst.msk [vmem:[%s516_s24 + $0x38] sm:$0xff] %vm278_vm3, %v277_v59 }
  0x3d PF: > { %s12_s11 = sadd.s32 1, %s467_s11   ;;  %s546_s9 = smov %s463_s10 }
  0x3e   : > { %p9_p5 = scmp.ge.s32.totalorder %s12_s11, 4   ;;  %s547_s10 = smov %s549_s12 }
  0x40   :  { %11 = sbr.rel (!%p9_p5) target bundleno = 2 (0x2), region = 61 }

// kernel: unet_down.2
= control target key start
LH: loop header
LB: loop body
LE: loop exit
PB: predicated region body
PF: predicated region fallthrough
CT: control target
= control target key end

     0   :  { %s706_s12 = smov 0   ;;  %s708_s13 = smov 0   ;;  %s811_s0 = inlined_call_operand.vmem [shape: bf16[2,64,64], index: 0, kind: input, shape index: {}]   ;;  %s812_s1 = inlined_call_operand.vmem [shape: bf16[1,64,8], index: 1, kind: input, shape index: {}]   ;;  %s813_s2 = inlined_call_operand.vmem [shape: bf16[2,64,8], index: 2, kind: output, shape index: {0}]   ;;  %s814_s3 = inlined_call_operand.vmem [shape: f32[2,1,2,8], index: 3, kind: output, shape index: {1}]  }
   0x1   :  { %s710_s14 = smov 0  }
   0x2 LB: > { %s33_s15 = sadd.s32 1, %s679_s13  ;;  %p570_p0 = scmp.ge.s32.totalorder %s683_s14, 1  ;;  %s683_s14 = sphi %s710_s14, %s14_s14   ;;  %s679_s13 = sphi %s708_s13, %s816_s13   ;;  %s675_s12 = sphi %s706_s12, %s815_s12  }
   0x3   : > { %p35_p1 = scmp.ge.s32.totalorder %s33_s15, 2  ;;  %p173_p2 = scmp.lt.s32.totalorder %s683_s14, 3 }
   0x5   : > { %s818_s15 = smov (%p35_p1, %s33_s15), 0  ;;  %p174_p3 = pnand %p570_p0, %p173_p2 }
   0x6   : > { %p213_p4 = scmp.lt.s32.totalorder (!%p174_p3), %s675_s12, 1 }
   0x7   : > { %177 = sbr.rel (%p174_p3) target bundleno = 204 (0xcc), region = 28 }
   0xc   : > { %v623_v0 = vld [vmem:[%s812_s1 + $0x18] sm:$0xff]  ;;  %v622_v1 = vld [vmem:[%s812_s1 + $0x10] sm:$0xff]  ;;  %s820_s12 = smov (!%p213_p4, %s675_s12), 1  ;;  %vm244_vm0 = vcmask 58368   ;;  %v621_v2 = vld [vmem:[%s812_s1 + $0x8] sm:$0xff]  ;;  %v685_v3 = vmov 0.0  }
   0xd   : > { %323 = vmatpush.bf16.msra.mxu0 %v623_v0  ;;  %624 = vmatpush.bf16.msra.mxu1 %v623_v0  ;;  %s575_s20 = sshll.u32 %s820_s12, 1  ;;  %s614_s26 = sshll.u32 %s820_s12, 5  ;;  %v620_v4 = vld [vmem:[%s812_s1] sm:$0xff]  ;;  %vm306_vm1 = vcmask 523264   ;;  %vm348_vm2 = vcmask 64512   ;;  %vm373_vm3 = vcmask 60416  }
   0xe   : > { %625 = vmatpush.bf16.msra.mxu2 %v623_v0  ;;  %626 = vmatpush.bf16.msra.mxu3 %v623_v0  ;;  %s739_s25 = scalar_lea.vmem %s814_s3, %s575_s20  ;;  %s217_s4 = scalar_lea.vmem %s811_s0, %s614_s26  ;;  %vm432_vm4 = vcmask 1040384  }
   0xf   : > { %245 = vst.msk [vmem:[%s739_s25] sm:$0x3] %vm244_vm0, %v685_v3  ;;  %v616_v5 = vld [vmem:[%s217_s4] sm:$0xff]  ;;  %v617_v6 = vld [vmem:[%s217_s4 + $0x8] sm:$0xff]  ;;  %v618_v7 = vld [vmem:[%s217_s4 + $0x10] sm:$0xff]  ;;  %s759_s7 = scalar_lea.vmem %s813_s2, %s614_s26 }
  0x10   : > { %v619_v8 = vld [vmem:[%s217_s4 + $0x18] sm:$0xff] }
  0x11   : > { %324 = vmatpush.bf16.msra.mxu0 %v622_v1  ;;  %627 = vmatpush.bf16.msra.mxu1 %v622_v1 }
  0x12   : > { %628 = vmatpush.bf16.msra.mxu2 %v622_v1  ;;  %629 = vmatpush.bf16.msra.mxu3 %v622_v1 }
  0x15   : > { %325 = vmatpush.bf16.msra.mxu0 %v621_v2  ;;  %630 = vmatpush.bf16.msra.mxu1 %v621_v2 }
  0x16   : > { %631 = vmatpush.bf16.msra.mxu2 %v621_v2  ;;  %632 = vmatpush.bf16.msra.mxu3 %v621_v2 }
  0x19   : > { %326 = vmatpush.bf16.msra.mxu0 %v620_v4  ;;  %633 = vmatpush.bf16.msra.mxu1 %v620_v4 }
  0x1a   : > { %634 = vmatpush.bf16.msra.mxu2 %v620_v4  ;;  %635 = vmatpush.bf16.msra.mxu3 %v620_v4 }
  0x1c   : > { %608 = vmatmul.msk.bf16.vlgmr.msra.gmra.mxu0 %vm306_vm1, %v616_v5  ;;  %609 = vmatmul.msk.bf16.vlgmr.msra.gmra.mxu1 %vm306_vm1, %v617_v6 }
  0x1d   : > { %610 = vmatmul.msk.bf16.vlgmr.msra.gmra.mxu2 %vm306_vm1, %v618_v7  ;;  %611 = vmatmul.msk.bf16.vlgmr.msra.gmra.mxu3 %vm306_vm1, %v619_v8 }
  0x99   : > { %v328_v9 = vpop.f32.mrf.mxu0  ;;  %v333_v10 = vpop.f32.mrf.mxu1 }
  0x9a   : > { %349 = vst.msk [vmem:[#allocation2] sm:$0xff] %vm348_vm2, %v328_v9 }
  0x9b   : > { %351 = vst.msk [vmem:[#allocation2 + $0x10] sm:$0xff] %vm348_vm2, %v333_v10 }
  0xa0   : > { %v338_v11 = vpop.f32.mrf.mxu2  ;;  %v343_v12 = vpop.f32.mrf.mxu3 }
  0xa1   : > { %v357_v13 = vld [vmem:[#allocation2] sm:$0xff]  ;;  %353 = vst.msk [vmem:[#allocation2 + $0x20] sm:$0xff] %vm348_vm2, %v338_v11  ;;  %v330_v14 = vpop.f32.mrf.mxu0  ;;  %v335_v18 = vpop.f32.mrf.mxu1 }
  0xa2   : > { %v365_v15 = vpack.c.bf16 %v357_v13, %v357_v13  ;;  %v359_v16 = vld [vmem:[#allocation2 + $0x10] sm:$0xff]  ;;  %355 = vst.msk [vmem:[#allocation2 + $0x30] sm:$0xff] %vm348_vm2, %v343_v12  ;;  %v403_v22 = vmul.f32 %v357_v13, %v357_v13  ;;  %v382_v25 = vsel %vm348_vm2, %v357_v13, 0.0 }
  0xa3   : > { %v367_v17 = vpack.c.bf16 %v359_v16, %v359_v16  ;;  %350 = vst.msk [vmem:[#allocation2 + $0x8] sm:$0xff] %vm348_vm2, %v330_v14  ;;  %v405_v28 = vmul.f32 %v359_v16, %v359_v16  ;;  %v385_v34 = vsel %vm348_vm2, %v359_v16, 0.0 }
  0xa4   : > { %374 = vst.msk [vmem:[%s759_s7] sm:$0xf] %vm373_vm3, %v365_v15  ;;  %v411_v33 = vsel %vm348_vm2, %v403_v22, 0.0 }
  0xa5   : > { %376 = vst.msk [vmem:[%s759_s7 + $0x8] sm:$0xf] %vm373_vm3, %v367_v17  ;;  %v414_v40 = vsel %vm348_vm2, %v405_v28, 0.0  ;;  %v434_v17 = vld [vmem:[%s739_s25] sm:$0x3] }
  0xa6   : > { %352 = vst.msk [vmem:[#allocation2 + $0x18] sm:$0xff] %vm348_vm2, %v335_v18 }
  0xa8   : > { %v361_v19 = vld [vmem:[#allocation2 + $0x20] sm:$0xff]  ;;  %v340_v20 = vpop.f32.mrf.mxu2  ;;  %v345_v21 = vpop.f32.mrf.mxu3 }
  0xa9   : > { %v369_v23 = vpack.c.bf16 %v361_v19, %v361_v19  ;;  %v363_v24 = vld [vmem:[#allocation2 + $0x30] sm:$0xff]  ;;  %354 = vst.msk [vmem:[#allocation2 + $0x28] sm:$0xff] %vm348_vm2, %v340_v20  ;;  %v407_v41 = vmul.f32 %v361_v19, %v361_v19  ;;  %v389_v47 = vsel %vm348_vm2, %v361_v19, 0.0 }
  0xaa   : > { %v371_v26 = vpack.c.bf16 %v363_v24, %v363_v24  ;;  %v358_v27 = vld [vmem:[#allocation2 + $0x8] sm:$0xff]  ;;  %356 = vst.msk [vmem:[#allocation2 + $0x38] sm:$0xff] %vm348_vm2, %v345_v21  ;;  %v409_v56 = vmul.f32 %v363_v24, %v363_v24  ;;  %v393_v60 = vsel %vm348_vm2, %v363_v24, 0.0 }
  0xab   : > { %378 = vst.msk [vmem:[%s759_s7 + $0x10] sm:$0xf] %vm373_vm3, %v369_v23  ;;  %v366_v29 = vpack.c.bf16 %v358_v27, %v358_v27  ;;  %v383_v30 = vsel %vm348_vm2, %v358_v27, 0.0  ;;  %v404_v31 = vmul.f32 %v358_v27, %v358_v27  ;;  %v418_v55 = vsel %vm348_vm2, %v407_v41, 0.0 }
  0xac   : > { %380 = vst.msk [vmem:[%s759_s7 + $0x18] sm:$0xf] %vm373_vm3, %v371_v26  ;;  %v384_v32 = vadd.f32 %v383_v30, %v382_v25  ;;  %v422_v1 = vsel %vm348_vm2, %v409_v56, 0.0 }
  0xad   : > { %375 = vst.msk [vmem:[%s759_s7 + $0x4] sm:$0xf] %vm373_vm3, %v366_v29  ;;  %v412_v35 = vsel %vm348_vm2, %v404_v31, 0.0  ;;  %v360_v36 = vld [vmem:[#allocation2 + $0x18] sm:$0xff] }
  0xae   : > { %v413_v37 = vadd.f32 %v412_v35, %v411_v33  ;;  %v368_v38 = vpack.c.bf16 %v360_v36, %v360_v36  ;;  %v386_v39 = vadd.f32 %v385_v34, %v384_v32  ;;  %v387_v42 = vsel %vm348_vm2, %v360_v36, 0.0 }
  0xaf   : > { %v406_v43 = vmul.f32 %v360_v36, %v360_v36 }
  0xb0   : > { %377 = vst.msk [vmem:[%s759_s7 + $0xc] sm:$0xf] %vm373_vm3, %v368_v38  ;;  %v388_v44 = vadd.f32 %v387_v42, %v386_v39  ;;  %v415_v45 = vadd.f32 %v414_v40, %v413_v37  ;;  %v362_v46 = vld [vmem:[#allocation2 + $0x28] sm:$0xff] }
  0xb1   : > { %v416_v48 = vsel %vm348_vm2, %v406_v43, 0.0  ;;  %v370_v49 = vpack.c.bf16 %v362_v46, %v362_v46  ;;  %v408_v50 = vmul.f32 %v362_v46, %v362_v46  ;;  %v364_v51 = vld [vmem:[#allocation2 + $0x38] sm:$0xff]  ;;  %v391_v57 = vsel %vm348_vm2, %v362_v46, 0.0 }
  0xb2   : > { %v417_v52 = vadd.f32 %v416_v48, %v415_v45  ;;  %v390_v53 = vadd.f32 %v389_v47, %v388_v44  ;;  %v372_v54 = vpack.c.bf16 %v364_v51, %v364_v51  ;;  %v410_v62 = vmul.f32 %v364_v51, %v364_v51 }
  0xb3   : > { %379 = vst.msk [vmem:[%s759_s7 + $0x14] sm:$0xf] %vm373_vm3, %v370_v49  ;;  %v420_v61 = vsel %vm348_vm2, %v408_v50, 0.0  ;;  %v395_v2 = vsel %vm348_vm2, %v364_v51, 0.0 }
  0xb4   : > { %v392_v58 = vadd.f32 %v391_v57, %v390_v53  ;;  %v419_v59 = vadd.f32 %v418_v55, %v417_v52  ;;  %381 = vst.msk [vmem:[%s759_s7 + $0x1c] sm:$0xf] %vm373_vm3, %v372_v54  ;;  %v424_v5 = vsel %vm348_vm2, %v410_v62, 0.0 }
  0xb6   : > { %v421_v63 = vadd.f32 %v420_v61, %v419_v59  ;;  %v394_v0 = vadd.f32 %v393_v60, %v392_v58 }
  0xb8   : > { %v396_v3 = vadd.f32 %v395_v2, %v394_v0  ;;  %v423_v4 = vadd.f32 %v422_v1, %v421_v63 }
  0xba   : > { %v397_v6 = vrot.slane %v396_v3, 4  ;;  %v425_v7 = vadd.f32 %v424_v5, %v423_v4 }
  0xbc   : > { %v398_v8 = vadd.f32 %v397_v6, %v396_v3  ;;  %v426_v9 = vrot.slane %v425_v7, 4 }
  0xbe   : > { %v399_v10 = vrot.slane %v398_v8, 2  ;;  %v427_v11 = vadd.f32 %v426_v9, %v425_v7 }
  0xc0   : > { %v400_v12 = vadd.f32 %v399_v10, %v398_v8  ;;  %v428_v13 = vrot.slane %v427_v11, 2 }
  0xc2   : > { %v401_v14 = vrot.slane %v400_v12, 1  ;;  %v429_v15 = vadd.f32 %v428_v13, %v427_v11 }
  0xc4   : > { %v430_v16 = vrot.slane %v429_v15, 1  ;;  %v402_v18 = vadd.f32 %v401_v14, %v400_v12 }
  0xc6   : > { %v431_v19 = vadd.f32 %v430_v16, %v429_v15 }
  0xc8   : > { %v433_v20 = vsel %vm432_vm4, %v402_v18, %v431_v19 }
  0xc9   : > { %v435_v21 = vadd.f32 %v434_v17, %v433_v20 }
  0xcb   : > { %437 = vst.msk [vmem:[%s739_s25] sm:$0x3] %vm244_vm0, %v435_v21 }
  0xcc PF: > { %s14_s14 = sadd.s32 1, %s683_s14   ;;  %s815_s12 = smov %s679_s13 }
  0xcd   : > { %p11_p5 = scmp.ge.s32.totalorder %s14_s14, 4   ;;  %s816_s13 = smov %s818_s15 }
  0xcf   :  { %13 = sbr.rel (!%p11_p5) target bundleno = 2 (0x2), region = 74 }

</bundles_post_ra>
